<compile_context>
chip_gen: v5e
topology: v5e:2x2
jax: 0.10.0
libtpu: 0.0.40
codegen_flags: <defaults>
</compile_context>

<pallas_src>
import math

import jax
import jax.numpy as jnp
from jax.experimental import pallas as pl
from jax.experimental.pallas import tpu as pltpu

LANES = 128
MAX_BLOCK_BYTES = 1 << 20     # ~1 MiB per input per pipeline buffer (~85% of HBM roofline)
MAX_ACC_ROWS = 8              # accumulator leading dim: a handful of vregs


def _cdiv(a, b):
    return (a + b - 1) // b


def _native_sublanes(dtype):
    # Native TPU tile is (32 // itemsize, 128): 8 for f32, 16 for bf16, 32 for int8/fp8.
    return max(8, 32 // jnp.dtype(dtype).itemsize)


def _num_tensorcores():
    """Best-effort TensorCores-per-chip (2 on v7x, 1 on v5e/v6e). Defaults to 1."""
    try:
        info = pltpu.get_tpu_info()
    except Exception:
        return 1
    for attr in ("num_tensorcores", "tensorcores_per_chip", "num_cores", "cores_per_chip"):
        val = getattr(info, attr, None)
        if isinstance(val, int) and val >= 1:
            return min(int(val), 2)
    return 1


def _make_kernel(*, steps_per_core, chunks_per_step, sublanes, acc_rows,
                 full_blocks, step_elems, n_elems, needs_mask):
    groups = chunks_per_step // acc_rows

    def kernel(yp_ref, yt_ref, out_ref, acc_ref):
        s = pl.program_id(1)

        @pl.when(s == 0)
        def _init():
            acc_ref[...] = jnp.zeros_like(acc_ref)

        x = yp_ref[...].astype(jnp.float32)
        y = yt_ref[...].astype(jnp.float32)
        # Numerically stable BCE with logits (same formulation PyTorch uses):
        #   max(x, 0) - x * y + log1p(exp(-|x|))
        z = jnp.maximum(x, 0.0) - x * y + jnp.log1p(jnp.exp(-jnp.abs(x)))

        def accumulate(vals):
            # Fold the (C, S, 128) tile into the small (acc_rows, S, 128) acc.
            # Leading-axis sums are plain VPU vreg adds (no XLU), and the
            # grouped fold keeps partial pairwise summation.
            acc_ref[...] += vals.reshape(acc_rows, groups, sublanes, LANES).sum(axis=1)

        if needs_mask:
            blk = pl.program_id(0) * steps_per_core + s

            @pl.when(blk < full_blocks)
            def _bulk():
                accumulate(z)

            @pl.when(blk >= full_blocks)
            def _tail():
                # Only the final (partial or fully out-of-range) step pays for
                # the mask; out-of-bounds garbage / zero padding is zeroed here.
                shape = (chunks_per_step, sublanes, LANES)
                gidx = (blk * step_elems
                        + jax.lax.broadcasted_iota(jnp.int32, shape, 0) * (sublanes * LANES)
                        + jax.lax.broadcasted_iota(jnp.int32, shape, 1) * LANES
                        + jax.lax.broadcasted_iota(jnp.int32, shape, 2))
                accumulate(jnp.where(gidx < n_elems, z, 0.0))
        else:
            accumulate(z)

        @pl.when(s == steps_per_core - 1)
        def _finalize():
            out_ref[...] = acc_ref[...].sum(axis=0, keepdims=True)

    return kernel


def kd_loss(y_pred_logits, y_cm_true, alpha=1.0, beta=0.5, temperature=2,
            num_cores=None):
    """Pallas implementation of KDLoss.forward. Returns a scalar f32.

    Matches: alpha * F.binary_cross_entropy_with_logits(y_pred_logits, y_cm_true)
    (beta / temperature are accepted for signature parity but unused, exactly
    as in the reference module's forward).
    """
    assert y_pred_logits.shape == y_cm_true.shape
    n_elems = int(y_pred_logits.size)
    assert n_elems > 0

    if num_cores is None:
        num_cores = _num_tensorcores()

    sublanes = max(_native_sublanes(y_pred_logits.dtype),
                   _native_sublanes(y_cm_true.dtype))
    chunk_elems = sublanes * LANES
    n_chunks = _cdiv(n_elems, chunk_elems)

    max_itemsize = max(jnp.dtype(y_pred_logits.dtype).itemsize,
                       jnp.dtype(y_cm_true.dtype).itemsize)
    max_chunks = max(MAX_BLOCK_BYTES // (chunk_elems * max_itemsize), 1)
    chunks_per_step = min(n_chunks, max_chunks)
    if chunks_per_step >= MAX_ACC_ROWS:
        chunks_per_step -= chunks_per_step % MAX_ACC_ROWS
    acc_rows = math.gcd(chunks_per_step, MAX_ACC_ROWS)

    n_blocks = _cdiv(n_chunks, chunks_per_step)
    steps_per_core = _cdiv(n_blocks, num_cores)
    step_elems = chunks_per_step * chunk_elems
    full_blocks = n_elems // step_elems                       # blocks with no masking needed
    total_covered = num_cores * steps_per_core * step_elems
    needs_mask = total_covered != n_elems
    needs_clamp = num_cores * steps_per_core > n_blocks       # some steps are fully OOB

    # Flatten; contiguous reshapes are free. Pad (with zeros) only up to the
    # next (sublanes, 128) chunk boundary; the padded tail is masked to zero
    # in-kernel, so no sentinel values are needed.
    flat_p = y_pred_logits.reshape(-1)
    flat_t = y_cm_true.reshape(-1)
    pad = n_chunks * chunk_elems - n_elems
    if pad:
        # TODO(synk): even this tiny jnp.pad copies the whole array in HBM; a
        # fully pad-free path would need a separate tail kernel / manual DMA.
        flat_p = jnp.pad(flat_p, (0, pad))
        flat_t = jnp.pad(flat_t, (0, pad))

    yp3 = flat_p.reshape(n_chunks, sublanes, LANES)
    yt3 = flat_t.reshape(n_chunks, sublanes, LANES)

    if needs_clamp:
        def in_index_map(p, s):
            # Keep the DMA origin in bounds for fully out-of-range steps; their
            # contribution is masked to zero inside the kernel.
            return (jnp.minimum(p * steps_per_core + s, n_blocks - 1), 0, 0)
    else:
        def in_index_map(p, s):
            return (p * steps_per_core + s, 0, 0)

    in_spec = pl.BlockSpec((chunks_per_step, sublanes, LANES), in_index_map)
    out_spec = pl.BlockSpec((1, sublanes, LANES), lambda p, s: (p, 0, 0))

    kernel = _make_kernel(
        steps_per_core=steps_per_core, chunks_per_step=chunks_per_step,
        sublanes=sublanes, acc_rows=acc_rows, full_blocks=full_blocks,
        step_elems=step_elems, n_elems=n_elems, needs_mask=needs_mask)

    in_bytes = n_elems * (jnp.dtype(y_pred_logits.dtype).itemsize
                          + jnp.dtype(y_cm_true.dtype).itemsize)
    cost = pl.CostEstimate(
        flops=8 * n_elems,
        transcendentals=2 * n_elems,
        bytes_accessed=in_bytes + num_cores * chunk_elems * 4)

    partials = pl.pallas_call(
        kernel,
        out_shape=jax.ShapeDtypeStruct((num_cores, sublanes, LANES), jnp.float32),
        grid_spec=pltpu.PrefetchScalarGridSpec(
            num_scalar_prefetch=0,
            grid=(num_cores, steps_per_core),
            in_specs=[in_spec, in_spec],
            out_specs=out_spec,
            scratch_shapes=[pltpu.VMEM((acc_rows, sublanes, LANES), jnp.float32)],
        ),
        compiler_params=pltpu.CompilerParams(
            dimension_semantics=("parallel", "arbitrary"),
            vmem_limit_bytes=32 * 1024 * 1024),
        cost_estimate=cost,
    )(yp3, yt3)

    # Combine per-core per-lane partials (sum first, then normalize/scale).
    return (alpha / n_elems) * jnp.sum(partials)


def _reference(y_pred, y_true, alpha=1.0):
    x = y_pred.astype(jnp.float32)
    y = y_true.astype(jnp.float32)
    bce = jnp.mean(jnp.maximum(x, 0.0) - x * y + jnp.log1p(jnp.exp(-jnp.abs(x))))
    return alpha * bce


if __name__ == "__main__":
    key = jax.random.PRNGKey(0)
    k1, k2 = jax.random.split(key)
    # (N, C, H, W) student logits + soft teacher confidence map in [0, 1].
    y_pred = jax.random.normal(k1, (2, 4, 16, 16), dtype=jnp.float32) * 2.0
    y_true = jax.random.uniform(k2, (2, 4, 16, 16), dtype=jnp.float32)

    loss = kd_loss(y_pred, y_true, alpha=1.0)
    loss = jax.block_until_ready(loss)

    ref = _reference(y_pred, y_true, alpha=1.0)
    assert jnp.allclose(loss, ref, rtol=1e-5, atol=1e-6), (loss, ref)
    print("KERNEL_OK")
</pallas_src>

<mosaic_0001>
module attributes {stable_mosaic.version = 11 : i64} {
  func.func @kernel(%arg0: i32, %arg1: i32, %arg2: memref<2x8x128xf32, #tpu.memory_space<vmem>>, %arg3: memref<2x8x128xf32, #tpu.memory_space<vmem>>, %arg4: memref<1x8x128xf32, #tpu.memory_space<vmem>>, %arg5: memref<2x8x128xf32, #tpu.memory_space<vmem>>) attributes {dimension_semantics = [#tpu.dimension_semantics<parallel>, #tpu.dimension_semantics<arbitrary>], iteration_bounds = array<i64: 1, 1>, scalar_prefetch = 0 : i64, scratch_operands = 1 : i64, tpu.core_type = #tpu.core_type<tc>, window_params = [{transform_indices = @transform_0, window_bounds = array<i64: 2, 8, 128>}, {transform_indices = @transform_1, window_bounds = array<i64: 2, 8, 128>}, {transform_indices = @transform_2, window_bounds = array<i64: 1, 8, 128>}]} {
    %c0_i32 = arith.constant 0 : i32
    %0 = arith.cmpi eq, %arg1, %c0_i32 : i32
    %1 = arith.extui %0 : i1 to i32
    %c0_i32_0 = arith.constant 0 : i32
    %2 = arith.cmpi ne, %1, %c0_i32_0 : i32
    scf.if %2 {
      %cst_16 = arith.constant 0.000000e+00 : f32
      %23 = vector.broadcast %cst_16 : f32 to vector<2x8x128xf32>
      %c0_17 = arith.constant 0 : index
      %c0_18 = arith.constant 0 : index
      %c0_19 = arith.constant 0 : index
      %24 = vector.load %arg5[%c0_17, %c0_18, %c0_19] : memref<2x8x128xf32, #tpu.memory_space<vmem>>, vector<2x8x128xf32>
      tpu.vector_store %arg5[%c0_17, %c0_18, %c0_19], %23 {strides = array<i32>} : memref<2x8x128xf32, #tpu.memory_space<vmem>>, vector<2x8x128xf32>,
    } else {
    }
    %c0 = arith.constant 0 : index
    %c0_1 = arith.constant 0 : index
    %c0_2 = arith.constant 0 : index
    %3 = vector.load %arg2[%c0, %c0_1, %c0_2] : memref<2x8x128xf32, #tpu.memory_space<vmem>>, vector<2x8x128xf32>
    %c0_3 = arith.constant 0 : index
    %c0_4 = arith.constant 0 : index
    %c0_5 = arith.constant 0 : index
    %4 = vector.load %arg3[%c0_3, %c0_4, %c0_5] : memref<2x8x128xf32, #tpu.memory_space<vmem>>, vector<2x8x128xf32>
    %cst = arith.constant 0.000000e+00 : f32
    %5 = vector.broadcast %cst : f32 to vector<2x8x128xf32>
    %6 = arith.maximumf %3, %5 : vector<2x8x128xf32>
    %7 = arith.mulf %3, %4 : vector<2x8x128xf32>
    %8 = arith.subf %6, %7 : vector<2x8x128xf32>
    %9 = math.absf %3 : vector<2x8x128xf32>
    %cst_6 = arith.constant 0.000000e+00 : f32
    %10 = vector.broadcast %cst_6 : f32 to vector<2x8x128xf32>
    %11 = arith.subf %10, %9 : vector<2x8x128xf32>
    %12 = math.exp %11 : vector<2x8x128xf32>
    %13 = math.log1p %12 : vector<2x8x128xf32>
    %14 = arith.addf %8, %13 : vector<2x8x128xf32>
    %c0_7 = arith.constant 0 : index
    %c0_8 = arith.constant 0 : index
    %c0_9 = arith.constant 0 : index
    %15 = vector.load %arg5[%c0_7, %c0_8, %c0_9] : memref<2x8x128xf32, #tpu.memory_space<vmem>>, vector<2x8x128xf32>
    %16 = vector.shape_cast %14 : vector<2x8x128xf32> to vector<2x1x8x128xf32>
    %cst_10 = arith.constant dense<0.000000e+00> : vector<2x8x128xf32>
    %17 = vector.multi_reduction <add>, %16, %cst_10 [1] : vector<2x1x8x128xf32> to vector<2x8x128xf32>
    %18 = arith.addf %15, %17 : vector<2x8x128xf32>
    %c0_11 = arith.constant 0 : index
    %c0_12 = arith.constant 0 : index
    %c0_13 = arith.constant 0 : index
    %19 = vector.load %arg5[%c0_11, %c0_12, %c0_13] : memref<2x8x128xf32, #tpu.memory_space<vmem>>, vector<2x8x128xf32>
    tpu.vector_store %arg5[%c0_11, %c0_12, %c0_13], %18 {strides = array<i32>} : memref<2x8x128xf32, #tpu.memory_space<vmem>>, vector<2x8x128xf32>,
    %c0_i32_14 = arith.constant 0 : i32
    %20 = arith.cmpi eq, %arg1, %c0_i32_14 : i32
    %21 = arith.extui %20 : i1 to i32
    %c0_i32_15 = arith.constant 0 : i32
    %22 = arith.cmpi ne, %21, %c0_i32_15 : i32
    scf.if %22 {
      %c0_16 = arith.constant 0 : index
      %c0_17 = arith.constant 0 : index
      %c0_18 = arith.constant 0 : index
      %23 = vector.load %arg5[%c0_16, %c0_17, %c0_18] : memref<2x8x128xf32, #tpu.memory_space<vmem>>, vector<2x8x128xf32>
      %cst_19 = arith.constant dense<0.000000e+00> : vector<8x128xf32>
      %24 = vector.multi_reduction <add>, %23, %cst_19 [0] : vector<2x8x128xf32> to vector<8x128xf32>
      %25 = vector.shape_cast %24 : vector<8x128xf32> to vector<1x8x128xf32>
      %c0_20 = arith.constant 0 : index
      %c0_21 = arith.constant 0 : index
      %c0_22 = arith.constant 0 : index
      %26 = vector.load %arg4[%c0_20, %c0_21, %c0_22] : memref<1x8x128xf32, #tpu.memory_space<vmem>>, vector<1x8x128xf32>
      tpu.vector_store %arg4[%c0_20, %c0_21, %c0_22], %25 {strides = array<i32>} : memref<1x8x128xf32, #tpu.memory_space<vmem>>, vector<1x8x128xf32>,
    } else {
    }
    return
  }
  func.func @transform_0(%arg0: i32, %arg1: i32) -> (i32, i32, i32) {
    %c1_i32 = arith.constant 1 : i32
    %0 = arith.muli %arg0, %c1_i32 : i32
    %1 = arith.addi %0, %arg1 : i32
    %c0_i32 = arith.constant 0 : i32
    %c0_i32_0 = arith.constant 0 : i32
    %c0_i32_1 = arith.constant 0 : i32
    return %1, %c0_i32, %c0_i32_0 : i32, i32, i32
  }
  func.func @transform_1(%arg0: i32, %arg1: i32) -> (i32, i32, i32) {
    %c1_i32 = arith.constant 1 : i32
    %0 = arith.muli %arg0, %c1_i32 : i32
    %1 = arith.addi %0, %arg1 : i32
    %c0_i32 = arith.constant 0 : i32
    %c0_i32_0 = arith.constant 0 : i32
    %c0_i32_1 = arith.constant 0 : i32
    return %1, %c0_i32, %c0_i32_0 : i32, i32, i32
  }
  func.func @transform_2(%arg0: i32, %arg1: i32) -> (i32, i32, i32) {
    %c0_i32 = arith.constant 0 : i32
    %c0_i32_0 = arith.constant 0 : i32
    %c0_i32_1 = arith.constant 0 : i32
    return %arg0, %c0_i32, %c0_i32_0 : i32, i32, i32
  }
}

</mosaic_0001>

<bundles_post_ra>
// kernel: tpu_custom_call.1
= control target key start
LH: loop header
LB: loop body
LE: loop exit
PB: predicated region body
PF: predicated region fallthrough
CT: control target
= control target key end

     0   :  { %7 = vsyncpa [#allocation4], 0  ;;  %s253_s0 = inlined_call_operand.hbm [shape: f32[2,8,128], index: 0, kind: input, shape index: {}]   ;;  %s254_s1 = inlined_call_operand.hbm [shape: f32[2,8,128], index: 1, kind: input, shape index: {}]   ;;  %s255_s2 = inlined_call_operand.hbm [shape: f32[1,8,128], index: 2, kind: output, shape index: {}]  }
   0x1   :  { %8 = vsyncpa [#allocation7], 0 }
   0x2   :  { %9 = vsyncpa [#allocation5], 0  ;;  %s18_s11 = sshll.u32 %s253_s0, 4  ;;  %s224_s12 = smov [#allocation3]   ;;  %s19_s11 = int_to_ptr.hbm [resolvable:$true] %s18_s11 }
   0x3   :  { %s20_s13 = sshll.u32 %s224_s12, 4  ;;  %s35_s16 = sshll.u32 %s254_s1, 4  ;;  %s21_s13 = int_to_ptr.vmem [resolvable:$true] %s20_s13  ;;  %s36_s16 = int_to_ptr.hbm [resolvable:$true] %s35_s16 }
   0x4   :  { %s225_s17 = smov 128   ;;  %s226_s18 = smov 8  }
   0x5   :  { %26 = dma.hbm_to_vmem [thread:$0]  %s19_s11, 256, %s21_s13, [#allocation4], %s225_s17, %s225_s17, %s226_s18  }
   0x6   :  { %s227_s19 = smov [#allocation6]  }
   0x7   :  { %s37_s20 = sshll.u32 %s227_s19, 4  ;;  %s38_s20 = int_to_ptr.vmem [resolvable:$true] %s37_s20 }
   0x8   :  { %43 = dma.hbm_to_vmem [thread:$0]  %s36_s16, 256, %s38_s20, [#allocation7], %s225_s17, %s225_s17, %s226_s18  }
   0x9   :  { %218 = dma.done.wait [#allocation4], 256  }
   0xa   :  { %219 = vsyncadd [#allocation4], 4294967040 }
   0xb   :  { %220 = dma.done.wait [#allocation7], 256  }
   0xc   :  { %221 = vsyncadd [#allocation7], 4294967040  ;;  %v62_v0 = vld [vmem:[#allocation3] sm:$0xff]  ;;  %v63_v1 = vld [vmem:[#allocation3 + $0x8] sm:$0xff]  ;;  %s228_s0 = smov [#allocation8]   ;;  %s122_s23 = sshll.u32 %s255_s2, 4  ;;  %s123_s23 = int_to_ptr.hbm [resolvable:$true] %s122_s23 }
   0xd   :  { %v72_v2 = vand.u32 2147483647, %v62_v0  ;;  %v73_v3 = vand.u32 2147483647, %v63_v1  ;;  %v64_v12 = vld [vmem:[#allocation6] sm:$0xff]  ;;  %v65_v15 = vld [vmem:[#allocation6 + $0x8] sm:$0xff] }
   0xe   :  { %v66_v17 = vmax.f32 %v62_v0, 0.0  ;;  %v68_v18 = vmul.f32 %v64_v12, %v62_v0  ;;  %v67_v21 = vmax.f32 %v63_v1, 0.0  ;;  %v69_v22 = vmul.f32 %v65_v15, %v63_v1  ;;  %s120_s1 = sshll.u32 %s228_s0, 4  ;;  %s121_s1 = int_to_ptr.vmem [resolvable:$true] %s120_s1 }
   0xf   :  { %v74_v4 = vsub.f32 0.0, %v72_v2  ;;  %v75_v5 = vsub.f32 0.0, %v73_v3 }
  0x10   :  { %v70_v26 = vsub.f32 %v66_v17, %v68_v18  ;;  %v71_v29 = vsub.f32 %v67_v21, %v69_v22 }
  0x11   :  { %v76_v6 = vmul.f32 1.442695, %v74_v4  ;;  %v78_v7 = vmul.f32 1.442695, %v75_v5 }
  0x13   :  { %138 = vpow2.f32 %v76_v6 }
  0x14   :  { %140 = vpow2.f32 %v78_v7 }
  0x19   :  { %v139_v8 = vpop.eup %138 }
  0x1a   :  { %v141_v9 = vpop.eup %140  ;;  %v80_v10 = vadd.f32 1.0, %v139_v8  ;;  %v83_v11 = vmul.f32 -0.5, %v139_v8  ;;  %v86_v19 = vand.u32 2147483647, %v139_v8 }
  0x1b   :  { %v89_v13 = vadd.f32 1.0, %v141_v9  ;;  %v92_v14 = vmul.f32 -0.5, %v141_v9  ;;  %v95_v23 = vand.u32 2147483647, %v141_v9 }
  0x1c   :  { %142 = vlog2.f32 %v80_v10  ;;  %v84_v16 = vadd.f32 1.0, %v83_v11  ;;  %vm87_vm0 = vcmp.lt.f32.partialorder %v86_v19, 0.0004427343 }
  0x1d   :  { %144 = vlog2.f32 %v89_v13  ;;  %v93_v20 = vadd.f32 1.0, %v92_v14  ;;  %vm96_vm1 = vcmp.lt.f32.partialorder %v95_v23, 0.0004427343 }
  0x1e   :  { %v85_v24 = vmul.f32 %v139_v8, %v84_v16 }
  0x1f   :  { %v94_v27 = vmul.f32 %v141_v9, %v93_v20 }
  0x22   :  { %v143_v25 = vpop.eup %142 }
  0x23   :  { %v145_v28 = vpop.eup %144  ;;  %v82_v30 = vmul.f32 0.6931472, %v143_v25 }
  0x24   :  { %v91_v31 = vmul.f32 0.6931472, %v145_v28 }
  0x25   :  { %v88_v32 = vsel %vm87_vm0, %v85_v24, %v82_v30 }
  0x26   :  { %v97_v33 = vsel %vm96_vm1, %v94_v27, %v91_v31  ;;  %v98_v34 = vadd.f32 %v88_v32, %v70_v26 }
  0x27   :  { %v99_v35 = vadd.f32 %v97_v33, %v71_v29 }
  0x29   :  { %v113_v36 = vadd.f32 %v99_v35, %v98_v34 }
  0x2b   :  { %114 = vst [vmem:[#allocation8] sm:$0xff] %v113_v36 }
  0x2c   :  { %125 = dma.vmem_to_hbm [thread:$0]  %s121_s1, 128, %s123_s23, [#allocation5]  }
  0x2d   :  { %222 = dma.done.wait [#allocation5], 128  }
  0x2e   :  { %223 = vsyncadd [#allocation5], 4294967168 }
  0x2f   :  { %130 = vsyncpa [#allocation4], 1 }
  0x30   :  { %131 = vsyncpa [#allocation7], 1 }
  0x31   :  { %132 = vsyncpa [#allocation5], 1 }

</bundles_post_ra>
